<compile_context>
chip_gen: v6e
topology: v6e:2x2x1
jax: 0.10.0
libtpu: 0.0.40
codegen_flags: <defaults>
</compile_context>

<pallas_src>
import jax
import jax.numpy as jnp
from jax.experimental import pallas as pl
from jax.experimental.pallas import tpu as pltpu

# ---- scaled-down, deterministic config (conf.*) -----------------------------
B = 2          # batch
S = 8          # conf.MAXLENGTH
HID = 128      # hidden_size   (scaled from 768)
EMB = 128      # embedding_size(scaled from 200)
FEAT = 32      # LingFeature 'Cluster' input dim (scaled from 200)
VOCAB = 256    # vocab_size
NCLASS = 4     # conf.CLASSNUM
OUT_PAD = 128  # lane-dense padded width for the logits output
BETA = 0.5     # conf.Beta
LN_EPS = 1e-5  # torch.nn.LayerNorm default eps

_VMEM = pltpu.MemorySpace.VMEM


# ---------------------------------------------------------------------------
# Fused kernel:
#   onehot = (ids == iota(VOCAB))                         (B*S, VOCAB)  [MXU gather]
#   rob    = onehot @ emb_table                           (B*S, HID)
#   em12   = ling @ [W1e' | W2']                          (B, 2*HID)    [fused]
#   em1,em2= em12 split + folded biases
#   g      = relu(rob @ W1r + em1)                        (B, S, HID)
#   H      = g * em2
#   alfa   = min(Beta * ||rob||_F / ||H||_F, 1)
#   cls    = LayerNorm(alfa * H[:,0,:] + rob[:,0,:])      (B, HID)
#   lm     = cls @ W_lm + b_lm ;  t = tanh(lm)            (dropout = identity)
#   out    = t @ W_cls_pad + b_cls_pad                    (B, OUT_PAD)
# ---------------------------------------------------------------------------
def fused_bert_kernel(ids_ref, emb_ref, ling_ref, w12_ref, w1r_ref,
                      slab_a_ref, wlm_ref, wcls_ref, slab_b_ref,
                      out_ref):
    # --- 1. one-hot MXU embedding gather (roberta hidden_states[0] stand-in) ---
    ids = ids_ref[...]                                              # (B*S, 1) int32
    iota = jax.lax.broadcasted_iota(jnp.int32, (B * S, VOCAB), 1)
    onehot = jnp.where(ids == iota, 1.0, 0.0).astype(jnp.bfloat16)  # (B*S, VOCAB)
    rob = jnp.dot(onehot, emb_ref[...],
                  preferred_element_type=jnp.float32)               # (B*S, HID) f32
    rob3 = rob.reshape(B, S, HID)

    # --- 2. AttnGating ---
    # unpack packed bias/LN slab (f32)
    b1e = slab_a_ref[0:1, :]       # (1, HID)
    b2e = slab_a_ref[1:2, :]
    gamma = slab_a_ref[2:3, :]
    beta = slab_a_ref[3:4, :]

    # sequence-invariant emotion projections, both in ONE dot (ling linear folded)
    ling_bf = ling_ref[...].astype(jnp.bfloat16)
    em12 = jnp.dot(ling_bf, w12_ref[...],
                   preferred_element_type=jnp.float32)              # (B, 2*HID)
    em1 = em12[:, :HID] + b1e                                       # (B, HID)
    em2 = em12[:, HID:] + b2e                                       # (B, HID)

    # roberta half of concat(emotion, rob) @ W1 as ONE flattened 2-D matmul
    g_rob = jnp.dot(rob.astype(jnp.bfloat16), w1r_ref[...],
                    preferred_element_type=jnp.float32)             # (B*S, HID)
    g = jnp.maximum(g_rob.reshape(B, S, HID) + em1[:, None, :], 0.0)  # ReLU
    h = g * em2[:, None, :]                                         # (B, S, HID)

    # alfa = min(Beta * ||rob||_F / ||H||_F, 1)   (guarded rsqrt)
    ss_rob = jnp.sum(rob * rob)
    ss_h = jnp.sum(h * h)
    alfa = jnp.minimum(BETA * jnp.sqrt(ss_rob) * jax.lax.rsqrt(ss_h + 1e-12), 1.0)

    # only seq position 0 feeds the (synthetic) LM head -> LayerNorm just cls
    e_cls = alfa * h[:, 0, :] + rob3[:, 0, :]                       # (B, HID)
    mu = jnp.mean(e_cls, axis=-1, keepdims=True)
    var = jnp.mean((e_cls - mu) ** 2, axis=-1, keepdims=True)
    cls_embed = (e_cls - mu) * jax.lax.rsqrt(var + LN_EPS)
    cls_embed = cls_embed * gamma + beta
    # dropout: identity (eval mode)

    # --- 3. LM head (synthetic) + classifier head ---
    b_lm = slab_b_ref[0:1, :]                                       # (1, VOCAB)
    b_cls = slab_b_ref[1:2, 0:OUT_PAD]                              # (1, OUT_PAD)
    lm_logits = jnp.dot(cls_embed.astype(jnp.bfloat16), wlm_ref[...],
                        preferred_element_type=jnp.float32) + b_lm  # (B, VOCAB)
    t = jnp.tanh(lm_logits)                     # dropout -> tanh -> dropout
    out_ref[...] = jnp.dot(t.astype(jnp.bfloat16), wcls_ref[...],
                           preferred_element_type=jnp.float32) + b_cls


# ---------------------------------------------------------------------------
# Parameter folding (done ONCE, outside the hot path):
#   W1e' = wl @ W1[:EMB]   b1e' = bl @ W1[:EMB]
#   W2'  = wl @ W2         b2'  = bl @ W2
#   W12  = [W1e' | W2']    (single fused emotion projection, bf16)
#   W1r  = W1[EMB:]        (roberta part of the concat, bf16)
#   slab_a (8,128) f32 : rows 0..3 = b1e', b2', ln_gamma, ln_beta
#   slab_b (2,256) f32 : row 0 = b_lm, row 1[:OUT_PAD] = padded b_cls
#   w_cls zero-padded to OUT_PAD lanes for a lane-dense output store.
# ---------------------------------------------------------------------------
def fold_params(params):
    w1e = params['w1'][:EMB]       # emotion part of the concat (comes first)
    w1r = params['w1'][EMB:]       # roberta part of the concat
    w1e_f = params['wl'] @ w1e                 # (FEAT, HID)
    w2e_f = params['wl'] @ params['w2']        # (FEAT, HID)
    b1e_f = params['bl'] @ w1e                 # (1, HID)
    b2e_f = params['bl'] @ params['w2']        # (1, HID)

    slab_a = (jnp.zeros((8, HID), jnp.float32)
              .at[0].set(b1e_f[0]).at[1].set(b2e_f[0])
              .at[2].set(params['ln_gamma'][0]).at[3].set(params['ln_beta'][0]))
    slab_b = (jnp.zeros((2, VOCAB), jnp.float32)
              .at[0].set(params['b_lm'][0])
              .at[1, :NCLASS].set(params['b_cls'][0]))
    w_cls_pad = (jnp.zeros((VOCAB, OUT_PAD), jnp.float32)
                 .at[:, :NCLASS].set(params['w_cls']))

    return {
        'emb_table': params['emb_table'].astype(jnp.bfloat16),
        'w12': jnp.concatenate([w1e_f, w2e_f], axis=1).astype(jnp.bfloat16),
        'w1r': w1r.astype(jnp.bfloat16),
        'slab_a': slab_a,
        'w_lm': params['w_lm'].astype(jnp.bfloat16),
        'w_cls_pad': w_cls_pad.astype(jnp.bfloat16),
        'slab_b': slab_b,
    }


# ---------------------------------------------------------------------------
# Wrapper: ONE grid-less pallas_call; everything resident in VMEM at this toy
# size (~200 KB total).  See scaling note at top for real-sized models / v7x.
# ---------------------------------------------------------------------------
def simple_bert_forward(inputs, fp):
    ids_2d = inputs['input_ids'].reshape(B * S, 1).astype(jnp.int32)
    args = (ids_2d, fp['emb_table'], inputs['input_feature'],
            fp['w12'], fp['w1r'], fp['slab_a'],
            fp['w_lm'], fp['w_cls_pad'], fp['slab_b'])

    flops = 2 * (B * S * VOCAB * HID      # one-hot gather
                 + B * FEAT * 2 * HID     # fused emotion projection
                 + B * S * HID * HID      # roberta part of W1
                 + B * HID * VOCAB        # LM head
                 + B * VOCAB * OUT_PAD)   # classifier
    bytes_accessed = sum(int(a.size) * a.dtype.itemsize for a in args) \
        + B * OUT_PAD * 4
    cost = pl.CostEstimate(flops=flops, transcendentals=B * VOCAB + 8,
                           bytes_accessed=bytes_accessed)

    out_pad = pl.pallas_call(
        fused_bert_kernel,
        out_shape=jax.ShapeDtypeStruct((B, OUT_PAD), jnp.float32),
        in_specs=[pl.BlockSpec(memory_space=_VMEM)] * len(args),
        out_specs=pl.BlockSpec(memory_space=_VMEM),
        compiler_params=pltpu.CompilerParams(vmem_limit_bytes=16 << 20),
        cost_estimate=cost,
    )(*args)
    return out_pad[:, :NCLASS]


# ---------------------------------------------------------------------------
if __name__ == "__main__":
    key = jax.random.PRNGKey(0)
    ks = jax.random.split(key, 12)

    params = {
        # synthetic LM embedding table (stands in for embedding_lm hidden[0])
        'emb_table': jax.random.normal(ks[0], (VOCAB, HID), jnp.float32) * 0.02,
        # AttnGating.linear (FEAT -> EMB)
        'wl': jax.random.uniform(ks[1], (FEAT, EMB), jnp.float32, -0.1, 0.1),
        'bl': jax.random.uniform(ks[2], (1, EMB), jnp.float32, -0.1, 0.1),
        # weight_emotion_W1 (HID+EMB, HID), weight_emotion_W2 (EMB, HID)
        'w1': jax.random.uniform(ks[3], (HID + EMB, HID), jnp.float32, -0.1, 0.1),
        'w2': jax.random.uniform(ks[4], (EMB, HID), jnp.float32, -0.1, 0.1),
        # LayerNorm(hidden) default init
        'ln_gamma': jnp.ones((1, HID), jnp.float32),
        'ln_beta': jnp.zeros((1, HID), jnp.float32),
        # synthetic LM head (HID -> VOCAB) producing logits
        'w_lm': jax.random.normal(ks[5], (HID, VOCAB), jnp.float32) * 0.02,
        'b_lm': jnp.zeros((1, VOCAB), jnp.float32),
        # SimpleBertModel.linear (VOCAB -> CLASSNUM)
        'w_cls': jax.random.uniform(ks[6], (VOCAB, NCLASS), jnp.float32, -0.05, 0.05),
        'b_cls': jnp.zeros((1, NCLASS), jnp.float32),
    }

    inputs = {
        'input_ids': jax.random.randint(ks[7], (B, S), 0, VOCAB, jnp.int32),
        # token_type_ids / attention_mask are consumed only by the pretrained
        # LM (replaced here); kept for interface fidelity.
        'token_type_ids': jnp.zeros((B, S), jnp.int32),
        'attention_mask': jnp.ones((B, S), jnp.int32),
        'input_feature': jax.random.normal(ks[8], (B, FEAT), jnp.float32),
    }

    fused_params = jax.tree_util.tree_map(jax.block_until_ready,
                                          fold_params(params))  # fold ONCE

    out = simple_bert_forward(inputs, fused_params)
    jax.block_until_ready(out)
    assert out.shape == (B, NCLASS)
    print("KERNEL_OK")
</pallas_src>

<mosaic_0001>
module attributes {stable_mosaic.version = 11 : i64} {
  func.func @fused_bert_kernel(%arg0: memref<16x1xi32, #tpu.memory_space<vmem>>, %arg1: memref<256x128xbf16, #tpu.memory_space<vmem>>, %arg2: memref<2x32xf32, #tpu.memory_space<vmem>>, %arg3: memref<32x256xbf16, #tpu.memory_space<vmem>>, %arg4: memref<128x128xbf16, #tpu.memory_space<vmem>>, %arg5: memref<8x128xf32, #tpu.memory_space<vmem>>, %arg6: memref<128x256xbf16, #tpu.memory_space<vmem>>, %arg7: memref<256x128xbf16, #tpu.memory_space<vmem>>, %arg8: memref<2x256xf32, #tpu.memory_space<vmem>>, %arg9: memref<2x128xf32, #tpu.memory_space<vmem>>) attributes {dimension_semantics = [], scalar_prefetch = 0 : i64, scratch_operands = 0 : i64, tpu.core_type = #tpu.core_type<tc>} {
    %c0 = arith.constant 0 : index
    %c0_0 = arith.constant 0 : index
    %0 = vector.load %arg0[%c0, %c0_0] : memref<16x1xi32, #tpu.memory_space<vmem>>, vector<16x1xi32>
    %1 = tpu.iota {dimensions = array<i32: 1>} : vector<16x256xi32>
    %2 = vector.broadcast %0 : vector<16x1xi32> to vector<16x256xi32>
    %3 = arith.cmpi eq, %2, %1 : vector<16x256xi32>
    %cst = arith.constant 1.000000e+00 : f32
    %cst_1 = arith.constant 0.000000e+00 : f32
    %4 = vector.broadcast %cst : f32 to vector<16x256xf32>
    %5 = vector.broadcast %cst_1 : f32 to vector<16x256xf32>
    %6 = arith.select %3, %4, %5 : vector<16x256xi1>, vector<16x256xf32>
    %7 = arith.truncf %6 : vector<16x256xf32> to vector<16x256xbf16>
    %c0_2 = arith.constant 0 : index
    %c0_3 = arith.constant 0 : index
    %8 = vector.load %arg1[%c0_2, %c0_3] : memref<256x128xbf16, #tpu.memory_space<vmem>>, vector<256x128xbf16>
    %cst_4 = arith.constant dense<0.000000e+00> : vector<16x128xf32>
    %9 = tpu.matmul %7, %8, %cst_4 {dimension_numbers = #tpu.dot_dimension_numbers<[1], [0], [0], [1], [0, 0, 1, 1], [], []>} : vector<16x256xbf16>, vector<256x128xbf16>, vector<16x128xf32> -> vector<16x128xf32>
    %10 = vector.shape_cast %9 : vector<16x128xf32> to vector<2x8x128xf32>
    %c0_5 = arith.constant 0 : index
    %c0_6 = arith.constant 0 : index
    %11 = vector.load %arg5[%c0_5, %c0_6] : memref<8x128xf32, #tpu.memory_space<vmem>>, vector<1x128xf32>
    %c1 = arith.constant 1 : index
    %c0_7 = arith.constant 0 : index
    %12 = vector.load %arg5[%c1, %c0_7] : memref<8x128xf32, #tpu.memory_space<vmem>>, vector<1x128xf32>
    %c2 = arith.constant 2 : index
    %c0_8 = arith.constant 0 : index
    %13 = vector.load %arg5[%c2, %c0_8] : memref<8x128xf32, #tpu.memory_space<vmem>>, vector<1x128xf32>
    %c3 = arith.constant 3 : index
    %c0_9 = arith.constant 0 : index
    %14 = vector.load %arg5[%c3, %c0_9] : memref<8x128xf32, #tpu.memory_space<vmem>>, vector<1x128xf32>
    %c0_10 = arith.constant 0 : index
    %c0_11 = arith.constant 0 : index
    %15 = vector.load %arg2[%c0_10, %c0_11] : memref<2x32xf32, #tpu.memory_space<vmem>>, vector<2x32xf32>
    %16 = arith.truncf %15 : vector<2x32xf32> to vector<2x32xbf16>
    %c0_12 = arith.constant 0 : index
    %c0_13 = arith.constant 0 : index
    %17 = vector.load %arg3[%c0_12, %c0_13] : memref<32x256xbf16, #tpu.memory_space<vmem>>, vector<32x256xbf16>
    %cst_14 = arith.constant dense<0.000000e+00> : vector<2x256xf32>
    %18 = tpu.matmul %16, %17, %cst_14 {dimension_numbers = #tpu.dot_dimension_numbers<[1], [0], [0], [1], [0, 0, 1, 1], [], []>} : vector<2x32xbf16>, vector<32x256xbf16>, vector<2x256xf32> -> vector<2x256xf32>
    %19 = vector.extract_strided_slice %18 {offsets = [0, 0], sizes = [2, 128], strides = [1, 1]} : vector<2x256xf32> to vector<2x128xf32>
    %20 = vector.broadcast %11 : vector<1x128xf32> to vector<2x128xf32>
    %21 = arith.addf %19, %20 : vector<2x128xf32>
    %22 = vector.extract_strided_slice %18 {offsets = [0, 128], sizes = [2, 128], strides = [1, 1]} : vector<2x256xf32> to vector<2x128xf32>
    %23 = vector.broadcast %12 : vector<1x128xf32> to vector<2x128xf32>
    %24 = arith.addf %22, %23 : vector<2x128xf32>
    %25 = arith.truncf %9 : vector<16x128xf32> to vector<16x128xbf16>
    %c0_15 = arith.constant 0 : index
    %c0_16 = arith.constant 0 : index
    %26 = vector.load %arg4[%c0_15, %c0_16] : memref<128x128xbf16, #tpu.memory_space<vmem>>, vector<128x128xbf16>
    %cst_17 = arith.constant dense<0.000000e+00> : vector<16x128xf32>
    %27 = tpu.matmul %25, %26, %cst_17 {dimension_numbers = #tpu.dot_dimension_numbers<[1], [0], [0], [1], [0, 0, 1, 1], [], []>} : vector<16x128xbf16>, vector<128x128xbf16>, vector<16x128xf32> -> vector<16x128xf32>
    %28 = vector.shape_cast %27 : vector<16x128xf32> to vector<2x8x128xf32>
    %29 = vector.shape_cast %21 : vector<2x128xf32> to vector<2x1x128xf32>
    %30 = vector.broadcast %29 : vector<2x1x128xf32> to vector<2x8x128xf32>
    %31 = arith.addf %28, %30 : vector<2x8x128xf32>
    %cst_18 = arith.constant 0.000000e+00 : f32
    %32 = vector.broadcast %cst_18 : f32 to vector<2x8x128xf32>
    %33 = arith.maximumf %31, %32 : vector<2x8x128xf32>
    %34 = vector.shape_cast %24 : vector<2x128xf32> to vector<2x1x128xf32>
    %35 = vector.broadcast %34 : vector<2x1x128xf32> to vector<2x8x128xf32>
    %36 = arith.mulf %33, %35 : vector<2x8x128xf32>
    %37 = arith.mulf %9, %9 : vector<16x128xf32>
    %38 = vector.shape_cast %37 : vector<16x128xf32> to vector<1x16x128xf32>
    %cst_19 = arith.constant dense<0.000000e+00> : vector<1xf32>
    %39 = vector.multi_reduction <add>, %38, %cst_19 [1, 2] : vector<1x16x128xf32> to vector<1xf32>
    %40 = vector.shape_cast %39 : vector<1xf32> to vector<1x1x1xf32>
    %41 = vector.extract %40[0, 0, 0] : f32 from vector<1x1x1xf32>
    %42 = arith.mulf %36, %36 : vector<2x8x128xf32>
    %43 = vector.shape_cast %42 : vector<2x8x128xf32> to vector<1x2x8x128xf32>
    %cst_20 = arith.constant dense<0.000000e+00> : vector<1xf32>
    %44 = vector.multi_reduction <add>, %43, %cst_20 [1, 2, 3] : vector<1x2x8x128xf32> to vector<1xf32>
    %45 = vector.shape_cast %44 : vector<1xf32> to vector<1x1x1x1xf32>
    %46 = vector.extract %45[0, 0, 0, 0] : f32 from vector<1x1x1x1xf32>
    %47 = math.sqrt %41 : f32
    %cst_21 = arith.constant 5.000000e-01 : f32
    %48 = arith.mulf %cst_21, %47 : f32
    %cst_22 = arith.constant 9.99999996E-13 : f32
    %49 = arith.addf %46, %cst_22 : f32
    %50 = math.rsqrt %49 : f32
    %51 = arith.mulf %48, %50 : f32
    %cst_23 = arith.constant 1.000000e+00 : f32
    %52 = arith.minimumf %51, %cst_23 : f32
    %53 = vector.extract_strided_slice %36 {offsets = [0, 0, 0], sizes = [2, 1, 128], strides = [1, 1, 1]} : vector<2x8x128xf32> to vector<2x1x128xf32>
    %54 = vector.shape_cast %53 : vector<2x1x128xf32> to vector<2x128xf32>
    %55 = vector.broadcast %52 : f32 to vector<2x128xf32>
    %56 = arith.mulf %55, %54 : vector<2x128xf32>
    %57 = vector.extract_strided_slice %10 {offsets = [0, 0, 0], sizes = [2, 1, 128], strides = [1, 1, 1]} : vector<2x8x128xf32> to vector<2x1x128xf32>
    %58 = vector.shape_cast %57 : vector<2x1x128xf32> to vector<2x128xf32>
    %59 = arith.addf %56, %58 : vector<2x128xf32>
    %cst_24 = arith.constant dense<0.000000e+00> : vector<2xf32>
    %60 = vector.multi_reduction <add>, %59, %cst_24 [1] : vector<2x128xf32> to vector<2xf32>
    %61 = vector.shape_cast %60 : vector<2xf32> to vector<2x1xf32>
    %cst_25 = arith.constant 1.280000e+02 : f32
    %62 = vector.broadcast %cst_25 : f32 to vector<2x1xf32>
    %63 = arith.divf %61, %62 : vector<2x1xf32>
    %64 = vector.broadcast %63 : vector<2x1xf32> to vector<2x128xf32>
    %65 = arith.subf %59, %64 : vector<2x128xf32>
    %66 = arith.mulf %65, %65 : vector<2x128xf32>
    %cst_26 = arith.constant dense<0.000000e+00> : vector<2xf32>
    %67 = vector.multi_reduction <add>, %66, %cst_26 [1] : vector<2x128xf32> to vector<2xf32>
    %68 = vector.shape_cast %67 : vector<2xf32> to vector<2x1xf32>
    %cst_27 = arith.constant 1.280000e+02 : f32
    %69 = vector.broadcast %cst_27 : f32 to vector<2x1xf32>
    %70 = arith.divf %68, %69 : vector<2x1xf32>
    %71 = vector.broadcast %63 : vector<2x1xf32> to vector<2x128xf32>
    %72 = arith.subf %59, %71 : vector<2x128xf32>
    %cst_28 = arith.constant 9.99999974E-6 : f32
    %73 = vector.broadcast %cst_28 : f32 to vector<2x1xf32>
    %74 = arith.addf %70, %73 : vector<2x1xf32>
    %75 = math.rsqrt %74 : vector<2x1xf32>
    %76 = vector.broadcast %75 : vector<2x1xf32> to vector<2x128xf32>
    %77 = arith.mulf %72, %76 : vector<2x128xf32>
    %78 = vector.broadcast %13 : vector<1x128xf32> to vector<2x128xf32>
    %79 = arith.mulf %77, %78 : vector<2x128xf32>
    %80 = vector.broadcast %14 : vector<1x128xf32> to vector<2x128xf32>
    %81 = arith.addf %79, %80 : vector<2x128xf32>
    %c0_29 = arith.constant 0 : index
    %c0_30 = arith.constant 0 : index
    %82 = vector.load %arg8[%c0_29, %c0_30] : memref<2x256xf32, #tpu.memory_space<vmem>>, vector<1x256xf32>
    %c1_31 = arith.constant 1 : index
    %c0_32 = arith.constant 0 : index
    %83 = vector.load %arg8[%c1_31, %c0_32] : memref<2x256xf32, #tpu.memory_space<vmem>>, vector<1x128xf32>
    %84 = arith.truncf %81 : vector<2x128xf32> to vector<2x128xbf16>
    %c0_33 = arith.constant 0 : index
    %c0_34 = arith.constant 0 : index
    %85 = vector.load %arg6[%c0_33, %c0_34] : memref<128x256xbf16, #tpu.memory_space<vmem>>, vector<128x256xbf16>
    %cst_35 = arith.constant dense<0.000000e+00> : vector<2x256xf32>
    %86 = tpu.matmul %84, %85, %cst_35 {dimension_numbers = #tpu.dot_dimension_numbers<[1], [0], [0], [1], [0, 0, 1, 1], [], []>} : vector<2x128xbf16>, vector<128x256xbf16>, vector<2x256xf32> -> vector<2x256xf32>
    %87 = vector.broadcast %82 : vector<1x256xf32> to vector<2x256xf32>
    %88 = arith.addf %86, %87 : vector<2x256xf32>
    %89 = math.tanh %88 : vector<2x256xf32>
    %90 = arith.truncf %89 : vector<2x256xf32> to vector<2x256xbf16>
    %c0_36 = arith.constant 0 : index
    %c0_37 = arith.constant 0 : index
    %91 = vector.load %arg7[%c0_36, %c0_37] : memref<256x128xbf16, #tpu.memory_space<vmem>>, vector<256x128xbf16>
    %cst_38 = arith.constant dense<0.000000e+00> : vector<2x128xf32>
    %92 = tpu.matmul %90, %91, %cst_38 {dimension_numbers = #tpu.dot_dimension_numbers<[1], [0], [0], [1], [0, 0, 1, 1], [], []>} : vector<2x256xbf16>, vector<256x128xbf16>, vector<2x128xf32> -> vector<2x128xf32>
    %93 = vector.broadcast %83 : vector<1x128xf32> to vector<2x128xf32>
    %94 = arith.addf %92, %93 : vector<2x128xf32>
    %c0_39 = arith.constant 0 : index
    %c0_40 = arith.constant 0 : index
    %95 = vector.load %arg9[%c0_39, %c0_40] : memref<2x128xf32, #tpu.memory_space<vmem>>, vector<2x128xf32>
    tpu.vector_store %arg9[%c0_39, %c0_40], %94 {strides = array<i32>} : memref<2x128xf32, #tpu.memory_space<vmem>>, vector<2x128xf32>,
    return
  }
}

</mosaic_0001>

<bundles_post_ra>
// kernel: tpu_custom_call.1
= control target key start
LH: loop header
LB: loop body
LE: loop exit
PB: predicated region body
PF: predicated region fallthrough
CT: control target
= control target key end

     0   :  { %14 = vsyncpa [#allocation3], 0  ;;  %s1520_s0 = inlined_call_operand.vmem [shape: s32[16,1], index: 0, kind: input, shape index: {}]   ;;  %s1521_s1 = inlined_call_operand.hbm [shape: bf16[256,128], index: 1, kind: input, shape index: {}]   ;;  %s1522_s2 = inlined_call_operand.vmem [shape: f32[2,32], index: 2, kind: input, shape index: {}]   ;;  %s1523_s3 = inlined_call_operand.hbm [shape: bf16[32,256], index: 3, kind: input, shape index: {}]   ;;  %s1524_s4 = inlined_call_operand.hbm [shape: bf16[128,128], index: 4, kind: input, shape index: {}]   ;;  %s1525_s5 = inlined_call_operand.vmem [shape: f32[8,128], index: 5, kind: input, shape index: {}]   ;;  %s1526_s6 = inlined_call_operand.hbm [shape: bf16[128,256], index: 6, kind: input, shape index: {}]   ;;  %s1527_s7 = inlined_call_operand.hbm [shape: bf16[256,128], index: 7, kind: input, shape index: {}]   ;;  %s1528_s8 = inlined_call_operand.vmem [shape: f32[2,256], index: 8, kind: input, shape index: {}]   ;;  %s1529_s9 = inlined_call_operand.hbm [shape: f32[2,128], index: 9, kind: output, shape index: {}]  }
   0x1   :  { %15 = vsyncpa [#allocation6], 0 }
   0x2   :  { %16 = vsyncpa [#allocation9], 0 }
   0x3   :  { %17 = vsyncpa [#allocation4], 0  ;;  %s1379_s30 = smov [#allocation5]  }
   0x4   :  { %s39_s10 = sshll.u32 %s1379_s30, 4  ;;  %s40_s10 = int_to_ptr.vmem [resolvable:$true] %s39_s10 }
   0x5   :  { %s1259_s11 = scalar_lea.vmem %s40_s10, 512  ;;  %p1264_p1 = scmp.lt.s32.totalorder %s40_s10, %s40_s10 }
   0x6   :  { %p1260_p0 = scmp.ne.s32.totalorder %s40_s10, %s1259_s11  ;;  %p1265_p2 = scmp.lt.s32.totalorder %s1259_s11, %s1259_s11 }
   0x8   :  { %p1266_p3 = por %p1265_p2, %p1264_p1 }
   0xa   :  { %p1267_p4 = pnand %p1266_p3, %p1260_p0 }
   0xc   :  { %1270 = shalt.err (!%p1267_p4)
}
   0xd   :  { %s1380_s12 = smov 128   ;;  %s1381_s13 = smov 8  }
   0xe   :  { %45 = dma.hbm_to_vmem [thread:$0]  %s1523_s3, 512, %s40_s10, [#allocation6], %s1380_s12, %s1380_s12, %s1381_s13  }
   0xf   :  { %s1382_s16 = smov [#allocation8]   ;;  %s1383_s18 = smov [#allocation2]  }
  0x10   :  { %s65_s17 = sshll.u32 %s1382_s16, 4  ;;  %s25_s19 = sshll.u32 %s1383_s18, 4  ;;  %s66_s17 = int_to_ptr.vmem [resolvable:$true] %s65_s17  ;;  %s26_s19 = int_to_ptr.vmem [resolvable:$true] %s25_s19 }
  0x11   :  { %s1279_s20 = scalar_lea.vmem %s66_s17, 2048  ;;  %p1284_p6 = scmp.lt.s32.totalorder %s66_s17, %s66_s17 }
  0x12   :  { %p1280_p5 = scmp.ne.s32.totalorder %s66_s17, %s1279_s20  ;;  %p1285_p7 = scmp.lt.s32.totalorder %s1279_s20, %s1279_s20 }
  0x14   :  { %p1286_p8 = por %p1285_p7, %p1284_p6 }
  0x16   :  { %p1287_p9 = pnand %p1286_p8, %p1280_p5 }
  0x18   :  { %1290 = shalt.err (!%p1287_p9)
}
  0x19   :  { %71 = dma.hbm_to_vmem [thread:$0]  %s1526_s6, 2048, %s66_s17, [#allocation9], %s1380_s12, %s1380_s12, %s1381_s13  }
  0x1a   :  { %s1299_s23 = scalar_lea.vmem %s26_s19, 2048  ;;  %p1304_p11 = scmp.lt.s32.totalorder %s26_s19, %s26_s19 }
  0x1b   :  { %p1300_p10 = scmp.ne.s32.totalorder %s26_s19, %s1299_s23  ;;  %p1305_p12 = scmp.lt.s32.totalorder %s1299_s23, %s1299_s23 }
  0x1d   :  { %p1306_p13 = por %p1305_p12, %p1304_p11 }
  0x1f   :  { %p1307_p0 = pnand %p1306_p13, %p1300_p10 }
  0x21   :  { %1310 = shalt.err (!%p1307_p0)
}
  0x22   :  { %s1384_s3 = smov 64   ;;  %s1385_s24 = smov 4  }
  0x23   :  { %31 = dma.hbm_to_vmem [thread:$0]  %s1521_s1, 2048, %s26_s19, [#allocation3], %s1384_s3, %s1384_s3, %s1385_s24  }
  0x24   :  { %s1386_s27 = smov [#allocation7]   ;;  %s1387_s29 = smov [#allocation10]  }
  0x25   :  { %s51_s28 = sshll.u32 %s1386_s27, 4  ;;  %s77_s30 = sshll.u32 %s1387_s29, 4  ;;  %s52_s28 = int_to_ptr.vmem [resolvable:$true] %s51_s28  ;;  %s78_s30 = int_to_ptr.vmem [resolvable:$true] %s77_s30 }
  0x26   :  { %s1319_s6 = scalar_lea.vmem %s52_s28, 1024  ;;  %p1324_p2 = scmp.lt.s32.totalorder %s52_s28, %s52_s28 }
  0x27   :  { %p1320_p1 = scmp.ne.s32.totalorder %s52_s28, %s1319_s6  ;;  %p1325_p3 = scmp.lt.s32.totalorder %s1319_s6, %s1319_s6 }
  0x29   :  { %p1326_p4 = por %p1325_p3, %p1324_p2 }
  0x2b   :  { %p1327_p5 = pnand %p1326_p4, %p1320_p1 }
  0x2d   :  { %1330 = shalt.err (!%p1327_p5)
}
  0x2e   :  { %57 = dma.hbm_to_vmem [thread:$0]  %s1524_s4, 1024, %s52_s28, [#allocation6], %s1384_s3, %s1384_s3, %s1385_s24  }
  0x2f   :  { %s1339_s12 = scalar_lea.vmem %s78_s30, 2048  ;;  %p1344_p7 = scmp.lt.s32.totalorder %s78_s30, %s78_s30 }
  0x30   :  { %p1340_p6 = scmp.ne.s32.totalorder %s78_s30, %s1339_s12  ;;  %p1345_p8 = scmp.lt.s32.totalorder %s1339_s12, %s1339_s12 }
  0x32   :  { %p1346_p9 = por %p1345_p8, %p1344_p7 }
  0x34   :  { %p1347_p10 = pnand %p1346_p9, %p1340_p6 }
  0x36   :  { %1350 = shalt.err (!%p1347_p10)
}
  0x37   :  { %83 = dma.hbm_to_vmem [thread:$0]  %s1527_s7, 2048, %s78_s30, [#allocation9], %s1384_s3, %s1384_s3, %s1385_s24  }
  0x38   :  { %1371 = dma.done.wait [#allocation3], 2048  }
  0x39   :  { %1372 = vsyncadd [#allocation3], 4294965248 }
  0x3a   :  { %1373 = dma.done.wait [#allocation6], 1536  }
  0x3b   :  { %1374 = vsyncadd [#allocation6], 4294965760 }
  0x3c   :  { %1375 = dma.done.wait [#allocation9], 4096  }
  0x3d   :  { %1376 = vsyncadd [#allocation9], 4294963200  ;;  %v1388_v0 = vmov 0   ;;  %v102_v1 = vld [vmem:[%s1520_s0] sm:$0xff]  ;;  %v103_v2 = vld [vmem:[%s1520_s0 + $0x8] sm:$0xff]  ;;  %vm322_vm0 = vcmask 261120   ;;  %v104_v31 = vlaneseq }
  0x3e   :  { %1170 = vset.pattern.permute.xlu0 %v1388_v0  ;;  %358 = vmatprep.mubr.bf16.mxu1 %v1388_v0  ;;  %v1171_v3 = vld [vmem:[#allocation2 + $0x78] sm:$0xff]   ;;  %v1173_v5 = vld [vmem:[#allocation2 + $0x70] sm:$0xff]   ;;  %v1175_v7 = vld [vmem:[#allocation2 + $0x68] sm:$0xff]   ;;  %v1389_v25 = vmov 0.0   ;;  %v1390_v36 = vmov 1.0|1.0  }
  0x3f   :  { %108 = vperm.xlu0 %1170, %v102_v1   ;;  %v1172_v4 = vld [vmem:[#allocation2 + $0x38] sm:$0xff]   ;;  %1073 = vmatprep.subr.bf16.mxu0 %v1171_v3  ;;  %v1174_v6 = vld [vmem:[#allocation2 + $0x30] sm:$0xff]   ;;  %v1176_v8 = vld [vmem:[#allocation2 + $0x28] sm:$0xff]   ;;  %v105_v32 = vand.u32 127, %v104_v31  ;;  %vm1391_vm7 = vmmov 0   ;;  %s1393_s26 = smov 1.0  }
  0x40   :  { %1074 = vmatpush3.bf16.msra.mxu0 %v1172_v4  ;;  %v1177_v9 = vld [vmem:[#allocation2 + $0x60] sm:$0xff]   ;;  %v1179_v11 = vld [vmem:[#allocation2 + $0x58] sm:$0xff]   ;;  %v1181_v13 = vld [vmem:[#allocation2 + $0x50] sm:$0xff]   ;;  %v1392_v61 = vmov 1966171168   ;;  %vm603_vm10 = vcmask 1041409  }
  0x41   :  { %1075 = vmatprep.subr.bf16.mxu0 %v1173_v5  ;;  %v1178_v10 = vld [vmem:[#allocation2 + $0x20] sm:$0xff]   ;;  %v1180_v12 = vld [vmem:[#allocation2 + $0x18] sm:$0xff]   ;;  %v1182_v17 = vld [vmem:[#allocation2 + $0x10] sm:$0xff]   ;;  %v106_v34 = vadd.s32 128, %v105_v32  ;;  %v485_v62 = vunpack.c.l.s4 %v1392_v61  ;;  %vm606_vm11 = vcmask 1041408   ;;  %s1394_s1 = smov [#allocation11]  }
  0x42   :  { %v1187_v14 = vld [vmem:[#allocation5 + $0x14] ss:$8 sps:$4 sm:$0xff]   ;;  %v1189_v15 = vld [vmem:[#allocation5 + $0x10] ss:$8 sps:$4 sm:$0xff]   ;;  %v1190_v16 = vld [vmem:[#allocation5 + $0x4] ss:$8 sps:$4 sm:$0xff]  }
  0x43   :  { %111 = vperm.xlu0 %1170, %v103_v2   ;;  %338 = vmatprep.subr.bf16.mxu1 %v1187_v14  ;;  %v1192_v18 = vld [vmem:[#allocation5] ss:$8 sps:$4 sm:$0xff]   ;;  %v1193_v24 = vld [vmem:[#allocation7 + $0x38] sm:$0xff]   ;;  %v1194_v27 = vld [vmem:[#allocation7 + $0x30] sm:$0xff]   ;;  %v486_v63 = vunpack.c.0.s8 %v485_v62  ;;  %s992_s13 = sshll.u32 %s1394_s1, 4  ;;  %s993_s13 = int_to_ptr.vmem [resolvable:$true] %s992_s13 }
  0x44   :  { %1076 = vmatpush3.bf16.msra.mxu0 %v1174_v6  ;;  %339 = vmatpush1.bf16.msra.mxu1 %v1189_v15  ;;  %v296_v19 = vld [vmem:[%s1522_s2] sm:$0x3]  ;;  %v1183_v20 = vld [vmem:[#allocation2 + $0x48] sm:$0xff]   ;;  %v1197_v30 = vld [vmem:[#allocation7 + $0x18] sm:$0xff]   ;;  %s1351_s4 = scalar_lea.vmem %s993_s13, 32  ;;  %p1356_p12 = scmp.lt.s32.totalorder %s993_s13, %s993_s13 }
  0x45   :  { %1077 = vmatprep.subr.bf16.mxu0 %v1175_v7  ;;  %340 = vmatprep.subr.bf16.mxu1 %v1190_v16  ;;  %v1184_v21 = vld [vmem:[#allocation2 + $0x8] sm:$0xff]   ;;  %v1185_v22 = vld [vmem:[#allocation2 + $0x40] sm:$0xff]   ;;  %v297_v23 = vpack.c.bf16 %v296_v19, %v296_v19  ;;  %v1198_v37 = vld [vmem:[#allocation7 + $0x10] sm:$0xff]   ;;  %p1352_p11 = scmp.ne.s32.totalorder %s993_s13, %s1351_s4  ;;  %p1357_p13 = scmp.lt.s32.totalorder %s1351_s4, %s1351_s4 }
  0x46   :  { %v1186_v26 = vld [vmem:[#allocation2] sm:$0xff]   ;;  %v1195_v28 = vld [vmem:[#allocation7 + $0x28] sm:$0xff]  }
  0x47   :  { %v1196_v29 = vld [vmem:[#allocation7 + $0x20] sm:$0xff]   ;;  %v1199_v38 = vld [vmem:[#allocation7 + $0x8] sm:$0xff]   ;;  %p1358_p0 = por %p1357_p13, %p1356_p12 }
  0x48   :  { %1078 = vmatpush3.bf16.msra.mxu0 %v1176_v8  ;;  %341 = vmatpush1.bf16.msra.mxu1 %v1192_v18  ;;  %v1200_v39 = vld [vmem:[#allocation7] sm:$0xff]  }
  0x49   :  { %1079 = vmatprep.subr.bf16.mxu0 %v1177_v9  ;;  %1126 = vmatprep.subr.bf16.mxu1 %v1389_v25  ;;  %v1028_v1 = vld [vmem:[%s1525_s5] ss:$0 sm:$0xff]  ;;  %v1029_v4 = vld [vmem:[%s1525_s5 + $0x1] ss:$0 sm:$0xff]  ;;  %p1359_p1 = pnand %p1358_p0, %p1352_p11 }
  0x4b   :  { %1027 = vmatmul.mubr.msk.bf16.vlgmr.msra.gmra.mxu1 %vm322_vm0, %v297_v23 }
  0x4c   :  { %1080 = vmatpush3.bf16.msra.mxu0 %v1178_v10  ;;  %1127 = vmatpush3.bf16.msra.mxu1 %v1193_v24 }
  0x4d   :  { %1081 = vmatprep.subr.bf16.mxu0 %v1179_v11  ;;  %1128 = vmatprep.subr.bf16.mxu1 %v1389_v25 }
  0x4e   :  { %1142 = vmatprep.mubr.msk.bf16.mxu1 %vm1391_vm7, %v1389_v25 }
  0x50   :  { %1082 = vmatpush3.bf16.msra.mxu0 %v1180_v12  ;;  %1129 = vmatpush3.bf16.msra.mxu1 %v1194_v27 }
  0x51   :  { %1083 = vmatprep.subr.bf16.mxu0 %v1181_v13  ;;  %1130 = vmatprep.subr.bf16.mxu1 %v1389_v25 }
  0x54   :  { %1084 = vmatpush3.bf16.msra.mxu0 %v1182_v17  ;;  %1131 = vmatpush3.bf16.msra.mxu1 %v1195_v28 }
  0x55   :  { %1085 = vmatprep.subr.bf16.mxu0 %v1183_v20  ;;  %1132 = vmatprep.subr.bf16.mxu1 %v1389_v25 }
  0x58   :  { %1086 = vmatpush3.bf16.msra.mxu0 %v1184_v21  ;;  %1133 = vmatpush3.bf16.msra.mxu1 %v1196_v29 }
  0x59   :  { %1087 = vmatprep.subr.bf16.mxu0 %v1185_v22  ;;  %1134 = vmatprep.subr.bf16.mxu1 %v1389_v25 }
  0x5c   :  { %1088 = vmatpush3.bf16.msra.mxu0 %v1186_v26  ;;  %1135 = vmatpush3.bf16.msra.mxu1 %v1197_v30 }
  0x5d   :  { %1136 = vmatprep.subr.bf16.mxu1 %v1389_v25 }
  0x60   :  { %1137 = vmatpush3.bf16.msra.mxu1 %v1198_v37 }
  0x61   :  { %1138 = vmatprep.subr.bf16.mxu1 %v1389_v25 }
  0x64   :  { %1139 = vmatpush3.bf16.msra.mxu1 %v1199_v38 }
  0x65   :  { %1140 = vmatprep.subr.bf16.mxu1 %v1389_v25 }
  0x68   :  { %1141 = vmatpush3.bf16.msra.mxu1 %v1200_v39 }
  0xba   :  { %v109_v33 = vpop.permute.xlu0 %108 }
  0xbb   :  { %vm113_vm1 = vcmp.eq.s32.totalorder %v109_v33, %v105_v32  ;;  %vm114_vm5 = vcmp.eq.s32.totalorder %v109_v33, %v106_v34 }
  0xbe   :  { %v112_v35 = vpop.permute.xlu0 %111 }
  0xbf   :  { %vm115_vm2 = vcmp.eq.s32.totalorder %v112_v35, %v105_v32  ;;  %vm116_vm3 = vcmp.eq.s32.totalorder %v112_v35, %v106_v34 }
  0xc0   :  { %vm1021_vm4 = vmpackc.low %vm115_vm2, %vm113_vm1 }
  0xc1   :  { %vm1019_vm6 = vmpackc.low %vm116_vm3, %vm114_vm5 }
  0xc2   :  { %1020 = vmatprep.mubr.msk.bf16.mxu0 %vm1019_vm6, %v1390_v36 }
  0xc3   :  { %1022 = vmatmul.mubr.msk.bf16.vlgmr.msra.gmra.mxu0 %vm1021_vm4, %v1390_v36 }
  0xc4   :  { %800 = vmatprep.mubr.bf16.mxu0 %v1388_v0  ;;  %v1482_v0 = vshrl.u32 %v104_v31, 7 }
  0xc6   :  { %v489_v2 = vsub.s32 %v486_v63, %v1482_v0  ;;  %v1492_v7 = vsub.s32 0, %v1482_v0 }
 0x10b   :  { %v360_v50 = vpop.f32.mrf.mxu1 }
 0x10c   :  { %v371_v3 = vadd.f32 %v1028_v1, %v360_v50 }
 0x10d   :  { %v362_v51 = vpop.f32.mrf.mxu1 }
 0x10e   :  { %v490_v5 = vrot.slane %v371_v3, %v489_v2  ;;  %v376_v6 = vadd.f32 %v1029_v4, %v362_v51  ;;  %v1203_v3 = vld [vmem:[#allocation8 + $0x74] ss:$8 sps:$4 sm:$0xff]   ;;  %v1206_v4 = vld [vmem:[#allocation8 + $0x64] ss:$8 sps:$4 sm:$0xff]  }
 0x10f   :  { %v364_v52 = vpop.f32.mrf.mxu1  ;;  %768 = vmatprep.subr.bf16.mxu0 %v1203_v3 }
 0x110   :  { %v491_v8 = vcombine.high %v490_v5, %v490_v5  ;;  %v527_v9 = vrot.slane %v376_v6, %v489_v2  ;;  %v498_v10 = vrot.slane %v490_v5, %v489_v2  ;;  %v1204_v5 = vld [vmem:[#allocation8 + $0x60] ss:$8 sps:$4 sm:$0xff]   ;;  %v1209_v6 = vld [vmem:[#allocation8 + $0x54] ss:$8 sps:$4 sm:$0xff]  }
 0x111   :  { %v365_v53 = vpop.f32.mrf.mxu1 }
 0x112   :  { %v528_v11 = vcombine.high %v527_v9, %v527_v9  ;;  %v535_v12 = vrot.slane %v527_v9, %v489_v2  ;;  %v509_v13 = vrot.slane %v498_v10, %v1492_v7  ;;  %v505_v14 = vrot.slane %v491_v8, %v489_v2  ;;  %v1207_v8 = vld [vmem:[#allocation8 + $0x50] ss:$8 sps:$4 sm:$0xff]   ;;  %v1212_v9 = vld [vmem:[#allocation8 + $0x44] ss:$8 sps:$4 sm:$0xff]   ;;  %v1210_v10 = vld [vmem:[#allocation8 + $0x40] ss:$8 sps:$4 sm:$0xff]  }
 0x114   :  { %v542_v18 = vrot.slane %v528_v11, %v489_v2  ;;  %v546_v20 = vrot.slane %v535_v12, %v1492_v7  ;;  %v513_v21 = vrot.slane %v505_v14, %v1492_v7  ;;  %v1215_v11 = vld [vmem:[#allocation8 + $0x34] ss:$8 sps:$4 sm:$0xff]   ;;  %v1213_v12 = vld [vmem:[#allocation8 + $0x30] ss:$8 sps:$4 sm:$0xff]   ;;  %v1216_v14 = vld [vmem:[#allocation8 + $0x20] ss:$8 sps:$4 sm:$0xff]  }
 0x116   :  { %v550_v27 = vrot.slane %v542_v18, %v1492_v7  ;;  %v1222_v18 = vld [vmem:[#allocation8] ss:$8 sps:$4 sm:$0xff]  }
 0x183   :  { %v1089_v40 = vpop.f32.mrf.mxu0 }
 0x185   :  { %v1090_v41 = vpop.f32.mrf.mxu0 }
 0x186   :  { %v1472_v43 = vadd.f32 %v1090_v41, %v1089_v40 }
 0x187   :  { %v1092_v42 = vpop.f32.mrf.mxu0 }
 0x188   :  { %v555_v47 = vmul.f32 %v1472_v43, %v1472_v43 }
 0x189   :  { %v1093_v44 = vpop.f32.mrf.mxu0 }
 0x18a   :  { %v1474_v45 = vadd.f32 %v1093_v44, %v1092_v42 }
 0x18c   :  { %v377_v46 = vpack.c.bf16 %v1474_v45, %v1472_v43  ;;  %v556_v48 = vmul.f32 %v1474_v45, %v1474_v45 }
 0x18e   :  { %1143 = vmatmul.mubr.bf16.vlgmr.msra.gmra.mxu1 %v377_v46  ;;  %v557_v49 = vadd.f32 %v556_v48, %v555_v47 }
 0x190   :  { %558 = vadd.xlane.f32.xlu1 %v557_v49 }
 0x219   :  { %v559_v54 = vpop.xlane.xlu1 %558 }
 0x21a   :  { %v560_v55 = vrot.slane %v559_v54, 4 }
 0x21c   :  { %v561_v56 = vadd.f32 %v560_v55, %v559_v54 }
 0x21e   :  { %v562_v57 = vrot.slane %v561_v56, 2 }
 0x220   :  { %v563_v58 = vadd.f32 %v562_v57, %v561_v56 }
 0x222   :  { %v564_v59 = vrot.slane %v563_v58, 1 }
 0x224   :  { %v565_v60 = vadd.f32 %v564_v59, %v563_v58 }
 0x226   :  { %1146 = vpush %v565_v60 }
 0x24e   :  { %v476_v15 = vpop.f32.mrf.mxu1 }
 0x24f   :  { %v516_v16 = vadd.f32 %v509_v13, %v476_v15  ;;  %v1218_v13 = vld [vmem:[#allocation8 + $0x24] ss:$8 sps:$4 sm:$0xff]   ;;  %v1221_v15 = vld [vmem:[#allocation8 + $0x14] ss:$8 sps:$4 sm:$0xff]  }
 0x250   :  { %v1144_v17 = vpop.f32.mrf.mxu1 }
 0x251   :  { %v518_v19 = vmax.f32 %v516_v16, 0.0  ;;  %v1219_v16 = vld [vmem:[#allocation8 + $0x10] ss:$8 sps:$4 sm:$0xff]   ;;  %v1224_v17 = vld [vmem:[#allocation8 + $0x4] ss:$8 sps:$4 sm:$0xff]  }
 0x252   :  { %v479_v22 = vpop.f32.mrf.mxu1 }
 0x253   :  { %v553_v23 = vmul.f32 %v546_v20, %v518_v19  ;;  %v517_v24 = vadd.f32 %v513_v21, %v479_v22  ;;  %v1225_v19 = vld [vmem:[#allocation10 + $0x78] sm:$0xff]   ;;  %v1227_v21 = vld [vmem:[#allocation10 + $0x70] sm:$0xff]  }
 0x254   :  { %v1145_v25 = vpop.f32.mrf.mxu1  ;;  %v1226_v20 = vld [vmem:[#allocation10 + $0x38] sm:$0xff]   ;;  %1104 = vmatprep.subr.bf16.mxu1 %v1225_v19  ;;  %v1228_v22 = vld [vmem:[#allocation10 + $0x30] sm:$0xff]  }
 0x255   :  { %v519_v26 = vmax.f32 %v517_v24, 0.0  ;;  %v567_v29 = vmul.f32 %v553_v23, %v553_v23  ;;  %1105 = vmatpush3.bf16.msra.mxu1 %v1226_v20  ;;  %v1230_v24 = vld [vmem:[#allocation10 + $0x28] sm:$0xff]  }
 0x256   :  { %1106 = vmatprep.subr.bf16.mxu1 %v1227_v21 }
 0x257   :  { %v554_v28 = vmul.f32 %v550_v27, %v519_v26  ;;  %s1147_s20 = spop %1146 }
 0x258   :  { %v579_v32 = vstv %s1147_s20 }
 0x259   :  { %v568_v30 = vmul.f32 %v554_v28, %v554_v28  ;;  %1241 = vrsqrt.f32 %v579_v32  ;;  %vm582_vm8 = vcmp.eq.f32.partialorder %v579_v32, inf  ;;  %v585_v44 = vand.u32 2147483648, %v579_v32  ;;  %1107 = vmatpush3.bf16.msra.mxu1 %v1228_v22 }
 0x25a   :  { %vm584_vm9 = vcmp.eq.f32.partialorder %v579_v32, 0.0 }
 0x25b   :  { %v569_v31 = vadd.f32 %v568_v30, %v567_v29  ;;  %v1038_v29 = vld [vmem:[%s1525_s5 + $0x2] ss:$0 sm:$0xff] }
 0x25d   :  { %570 = vadd.xlane.f32.xlu1 %v569_v31 }
 0x266   :  { %v1242_v35 = vpop.eup %1241 }
 0x267   :  { %v581_v38 = vmul.f32 %v1242_v35, %v579_v32 }
 0x269   :  { %v583_v41 = vsel %vm582_vm8, %v579_v32, %v581_v38  ;;  %v1039_v32 = vld [vmem:[%s1525_s5 + $0x3] ss:$0 sm:$0xff] }
 0x26a   :  { %v586_v46 = vsel %vm584_vm9, %v585_v44, %v583_v41 }
 0x2e6   :  { %v571_v33 = vpop.xlane.xlu1 %570 }
 0x2e7   :  { %v572_v34 = vrot.slane %v571_v33, 4 }
 0x2e9   :  { %v573_v36 = vadd.f32 %v572_v34, %v571_v33 }
 0x2eb   :  { %v574_v37 = vrot.slane %v573_v36, 2 }
 0x2ed   :  { %v575_v39 = vadd.f32 %v574_v37, %v573_v36 }
 0x2ef   :  { %v576_v40 = vrot.slane %v575_v39, 1 }
 0x2f1   :  { %v577_v42 = vadd.f32 %v576_v40, %v575_v39 }
 0x2f3   :  { %1148 = vpush %v577_v42 }
 0x2f4   :  { %1150 = vpush %v586_v46 }
 0x324   :  { %s1149_s21 = spop %1148 }
 0x325   :  { %s589_s22 = sadd.f32 1e-12, %s1149_s21  ;;  %s1151_s23 = spop %1150 }
 0x326   :  { %s588_s3 = smul.f32 0.5, %s1151_s23 }
 0x327   :  { %v590_v47 = vstv %s589_s22 }
 0x328   :  { %1243 = vrsqrt.f32 %v590_v47  ;;  %v1231_v47 = vld [vmem:[#allocation10 + $0x60] sm:$0xff]  }
 0x335   :  { %v1244_v48 = vpop.eup %1243 }
 0x336   :  { %1152 = vpush %v1244_v48  ;;  %v1232_v48 = vld [vmem:[#allocation10 + $0x20] sm:$0xff]  }
 0x367   :  { %s1153_s24 = spop %1152 }
 0x368   :  { %s593_s25 = smul.f32 %s1153_s24, %s588_s3 }
 0x36a   :  { %s594_s27 = smin.f32 %s1393_s26, %s593_s25 }
 0x36b   :  { %v595_v49 = vstv %s594_s27 }
 0x36c   :  { %v596_v50 = vmul.f32 %v595_v49, %v553_v23  ;;  %v597_v51 = vmul.f32 %v595_v49, %v554_v28  ;;  %v1229_v23 = vld [vmem:[#allocation10 + $0x68] sm:$0xff]   ;;  %v1233_v49 = vld [vmem:[#allocation10 + $0x58] sm:$0xff]  }
 0x36d   :  { %1108 = vmatprep.subr.bf16.mxu1 %v1229_v23 }
 0x36e   :  { %v599_v52 = vadd.f32 %v1474_v45, %v597_v51  ;;  %v598_v53 = vadd.f32 %v1472_v43, %v596_v50  ;;  %v1201_v43 = vld [vmem:[#allocation8 + $0x70] ss:$8 sps:$4 sm:$0xff]   ;;  %1109 = vmatpush3.bf16.msra.mxu1 %v1230_v24 }
 0x36f   :  { %769 = vmatpush1.bf16.msra.mxu0 %v1201_v43  ;;  %1110 = vmatprep.subr.bf16.mxu1 %v1231_v47  ;;  %v1234_v50 = vld [vmem:[#allocation10 + $0x18] sm:$0xff]   ;;  %v1235_v51 = vld [vmem:[#allocation10 + $0x50] sm:$0xff]  }
 0x370   :  { %v602_v54 = vrot.slane %v599_v52, 7  ;;  %770 = vmatprep.subr.bf16.mxu0 %v1206_v4 }
 0x372   :  { %v604_v55 = vsel %vm603_vm10, %v602_v54, %v598_v53  ;;  %1111 = vmatpush3.bf16.msra.mxu1 %v1232_v48  ;;  %v1238_v54 = vld [vmem:[#allocation10 + $0x8] sm:$0xff]  }
 0x373   :  { %v607_v56 = vsel %vm606_vm11, %v604_v55, 0.0  ;;  %771 = vmatpush1.bf16.msra.mxu0 %v1204_v5  ;;  %1112 = vmatprep.subr.bf16.mxu1 %v1233_v49  ;;  %v1239_v55 = vld [vmem:[#allocation10 + $0x40] sm:$0xff]  }
 0x374   :  { %608 = vadd.xlane.f32.xlu0 %v607_v56  ;;  %772 = vmatprep.subr.bf16.mxu0 %v1209_v6  ;;  %v1240_v56 = vld [vmem:[#allocation10] sm:$0xff]  }
 0x376   :  { %1113 = vmatpush3.bf16.msra.mxu1 %v1234_v50 }
 0x377   :  { %773 = vmatpush1.bf16.msra.mxu0 %v1207_v8  ;;  %1114 = vmatprep.subr.bf16.mxu1 %v1235_v51 }
 0x378   :  { %774 = vmatprep.subr.bf16.mxu0 %v1212_v9 }
 0x37b   :  { %775 = vmatpush1.bf16.msra.mxu0 %v1210_v10 }
 0x37c   :  { %776 = vmatprep.subr.bf16.mxu0 %v1215_v11 }
 0x37f   :  { %777 = vmatpush1.bf16.msra.mxu0 %v1213_v12 }
 0x380   :  { %778 = vmatprep.subr.bf16.mxu0 %v1218_v13 }
 0x383   :  { %779 = vmatpush1.bf16.msra.mxu0 %v1216_v14 }
 0x384   :  { %780 = vmatprep.subr.bf16.mxu0 %v1221_v15 }
 0x387   :  { %781 = vmatpush1.bf16.msra.mxu0 %v1219_v16 }
 0x388   :  { %782 = vmatprep.subr.bf16.mxu0 %v1224_v17 }
 0x38b   :  { %783 = vmatpush1.bf16.msra.mxu0 %v1222_v18 }
 0x3fd   :  { %v609_v57 = vpop.xlane.xlu0 %608 }
 0x3fe   :  { %v611_v58 = vmul.f32 0.0078125, %v609_v57  ;;  %v649_v57 = vld [vmem:[%s1528_s8] ss:$2 sm:$0x3] }
 0x400   :  { %v613_v59 = vrot.slane %v611_v58, 1  ;;  %v616_v60 = vsub.f32 %v598_v53, %v611_v58  ;;  %v1237_v53 = vld [vmem:[#allocation10 + $0x48] sm:$0xff]   ;;  %v676_v58 = vsub.s32 1, %v1482_v0  ;;  %v1056_v0 = vld [vmem:[%s1528_s8 + $0x1] ss:$0 sm:$0xff] }
 0x402   :  { %v617_v61 = vsub.f32 %v599_v52, %v613_v59  ;;  %v618_v63 = vmul.f32 %v616_v60, %v616_v60  ;;  %v1236_v52 = vld [vmem:[#allocation10 + $0x10] sm:$0xff]   ;;  %v673_v59 = vrot.slane %v649_v57, %v1492_v7 }
 0x403   :  { %1115 = vmatpush3.bf16.msra.mxu1 %v1236_v52 }
 0x404   :  { %v619_v62 = vmul.f32 %v617_v61, %v617_v61  ;;  %1116 = vmatprep.subr.bf16.mxu1 %v1237_v53 }
 0x406   :  { %v622_v1 = vrot.slane %v619_v62, 7 }
 0x407   :  { %1117 = vmatpush3.bf16.msra.mxu1 %v1238_v54 }
 0x408   :  { %v623_v2 = vsel %vm603_vm10, %v622_v1, %v618_v63  ;;  %1118 = vmatprep.subr.bf16.mxu1 %v1239_v55 }
 0x409   :  { %v625_v45 = vsel %vm606_vm11, %v623_v2, 0.0 }
 0x40a   :  { %626 = vadd.xlane.f32.xlu1 %v625_v45 }
 0x40b   :  { %1119 = vmatpush3.bf16.msra.mxu1 %v1240_v56 }
 0x493   :  { %v627_v25 = vpop.xlane.xlu1 %626 }
 0x494   :  { %v628_v26 = vmul.f32 0.0078125, %v627_v25 }
 0x496   :  { %v629_v27 = vadd.f32 1e-05, %v628_v26 }
 0x498   :  { %1245 = vrsqrt.f32 %v629_v27 }
 0x4a5   :  { %v1246_v28 = vpop.eup %1245 }
 0x4a6   :  { %v632_v30 = vrot.slane %v1246_v28, 1  ;;  %v635_v31 = vmul.f32 %v1246_v28, %v616_v60  ;;  %v677_v60 = vrot.slane %v649_v57, %v676_v58 }
 0x4a8   :  { %v636_v33 = vmul.f32 %v632_v30, %v617_v61  ;;  %v641_v34 = vmul.f32 %v1038_v29, %v635_v31 }
 0x4aa   :  { %v642_v35 = vmul.f32 %v1038_v29, %v636_v33  ;;  %v647_v36 = vadd.f32 %v1039_v32, %v641_v34 }
 0x4ac   :  { %v648_v37 = vadd.f32 %v1039_v32, %v642_v35  ;;  %v651_v38 = vpack.c.bf16 %v647_v36, %v647_v36 }
 0x4ae   :  { %v652_v39 = vpack.c.bf16 %v648_v37, %v648_v37  ;;  %v682_v41 = vunpack.c.l.b16 %v651_v38 }
 0x4b0   :  { %v683_v40 = vunpack.c.l.b16 %v652_v39 }
 0x4b2   :  { %v684_v42 = vrot.slane %v683_v40, 7 }
 0x4b4   :  { %v685_v44 = vsel %vm603_vm10, %v684_v42, %v682_v41 }
 0x4b5   :  { %v686_v46 = vpack.c.b16 %v685_v44, %v685_v44 }
 0x4b7   :  { %801 = vmatmul.mubr.bf16.vlgmr.msra.gmra.mxu0 %v686_v46 }
 0x577   :  { %v802_v61 = vpop.f32.mrf.mxu0 }
 0x578   :  { %v803_v62 = vadd.f32 %v802_v61, %v673_v59 }
 0x579   :  { %v804_v63 = vpop.f32.mrf.mxu0 }
 0x57a   :  { %v805_v1 = vadd.f32 %v804_v63, %v677_v60  ;;  %1247 = vtanh.f32 %v803_v62 }
 0x57b   :  { %v806_v2 = vpop.f32.mrf.mxu0 }
 0x57c   :  { %1249 = vtanh.f32 %v805_v1 }
 0x57d   :  { %v807_v45 = vpop.f32.mrf.mxu0 }
 0x587   :  { %v1248_v3 = vpop.eup %1247 }
 0x588   :  { %v811_v5 = vpack.c.bf16 %v1248_v3, %v1248_v3 }
 0x589   :  { %v1250_v43 = vpop.eup %1249 }
 0x58a   :  { %v812_v4 = vpack.c.bf16 %v1250_v43, %v1250_v43 }
 0x58c   :  { %977 = vmatprep.mubr.bf16.mxu1 %v812_v4 }
 0x58d   :  { %978 = vmatmul.mubr.bf16.vlgmr.msra.gmra.mxu1 %v811_v5 }
 0x64d   :  { %v1120_v6 = vpop.f32.mrf.mxu1 }
 0x64f   :  { %v1121_v7 = vpop.f32.mrf.mxu1 }
 0x650   :  { %v1122_v8 = vadd.f32 %v1121_v7, %v1120_v6 }
 0x651   :  { %v1123_v9 = vpop.f32.mrf.mxu1 }
 0x652   :  { %v980_v10 = vadd.f32 %v1122_v8, %v1056_v0 }
 0x653   :  { %v1124_v11 = vpop.f32.mrf.mxu1 }
 0x654   :  { %985 = vst [vmem:[#allocation11] sm:$0x3] %v980_v10 }
 0x655   :  { %1362 = shalt.err (!%p1359_p1)
}
 0x656   :  { %995 = dma.vmem_to_hbm [thread:$0]  %s993_s13, 32, %s1529_s9, [#allocation4]  }
 0x657   :  { %1377 = dma.done.wait [#allocation4], 32  }
 0x658   :  { %1378 = vsyncadd [#allocation4], 4294967264 }
 0x659   :  { %999 = vsyncpa [#allocation3], 1 }
 0x65a   :  { %1000 = vsyncpa [#allocation6], 1 }
 0x65b   :  { %1001 = vsyncpa [#allocation9], 1 }
 0x65c   :  { %1002 = vsyncpa [#allocation4], 1 }

</bundles_post_ra>
